<compile_context>
chip_gen: v7x
topology: tpu7x:2x2x1
jax: 0.10.0
libtpu: 0.0.40
codegen_flags: <defaults>
</compile_context>

<pallas_src>
import math

import jax
import jax.numpy as jnp
from jax.experimental import pallas as pl
from jax.experimental.pallas import tpu as pltpu


_VMEM_LIMIT = 64 * 1024 * 1024
_TAP_BYTES_BUDGET = 4 * 1024 * 1024   # per-block tap tile budget (f32 bytes)
_MAX_ROWS_PER_TILE = 32               # bounds in-kernel unrolling / VMEM


def _pick_tile(n, cap, align=1):
    """Largest divisor of n that is <= cap and a multiple of `align`; else n
    (full-extent blocks are always legal)."""
    cap = max(1, min(cap, n))
    for t in range(cap, 0, -1):
        if n % t == 0 and t % align == 0:
            return t
    return n


# ---------------------------------------------------------------------------
# Kernel 1: M-tiled matmul + folded BN + ReLU (first 3x3 conv via im2col;
# K = 27 so the whole weight stays VMEM-resident across the grid).
# ---------------------------------------------------------------------------
def _matmul_bn_relu_kernel(x_ref, w_ref, s_ref, b_ref, o_ref):
    acc = jnp.dot(x_ref[...], w_ref[...], preferred_element_type=jnp.float32)
    o_ref[...] = jnp.maximum(acc * s_ref[...] + b_ref[...], 0.0)


def matmul_bn_relu(x, w, scale, bias, tm_cap=512):
    M, K = x.shape
    _, N = w.shape
    TM = _pick_tile(M, tm_cap, align=8)
    return pl.pallas_call(
        _matmul_bn_relu_kernel,
        out_shape=jax.ShapeDtypeStruct((M, N), jnp.float32),
        grid=(M // TM,),
        in_specs=[
            pl.BlockSpec((TM, K), lambda i: (i, 0)),
            pl.BlockSpec((K, N), lambda i: (0, 0)),   # resident weight
            pl.BlockSpec((1, N), lambda i: (0, 0)),   # resident BN scale
            pl.BlockSpec((1, N), lambda i: (0, 0)),   # resident BN bias
        ],
        out_specs=pl.BlockSpec((TM, N), lambda i: (i, 0)),
        compiler_params=pltpu.CompilerParams(
            dimension_semantics=("parallel",),
            vmem_limit_bytes=_VMEM_LIMIT),
    )(x, w, scale.reshape(1, N), bias.reshape(1, N))


# ---------------------------------------------------------------------------
# Kernel 2: fused depthwise-3x3(+BN+ReLU) + pointwise-1x1(+BN+ReLU).
# One grid step processes TR output rows (flattened over batch*height).  Per
# row the 9 taps come from 3 row-shifted refs via static column slices, are
# accumulated in f32 on the VPU, then fed (bf16) directly to the MXU against
# the resident [Cin, Cout] pointwise weight — no intermediate HBM traffic.
# ---------------------------------------------------------------------------
def _make_dw_taps(x, stride):
    """Return ([3, N*Ho, Wt, C] row taps, per-kw column offsets, Ho, Wo)."""
    N, H, W, C = x.shape
    Ho = (H - 1) // stride + 1
    Wo = (W - 1) // stride + 1
    xp = jnp.pad(x, ((0, 0), (1, 1), (1, 1), (0, 0)))
    rows = [xp[:, kh:kh + (Ho - 1) * stride + 1:stride, :, :] for kh in range(3)]
    rt = jnp.stack(rows, axis=0).reshape(3, N * Ho, W + 2, C)
    if stride == 1:
        return rt, (0, 1, 2), Ho, Wo
    # stride 2: split even/odd columns in JAX so the kernel only needs
    # contiguous static slices (kw=0,2 -> even parity, kw=1 -> odd parity).
    ev = rt[:, :, 0::2, :]
    od = rt[:, :, 1::2, :]
    ce = ev.shape[2]
    taps = jnp.concatenate([ev, od], axis=2)
    return taps, (0, ce, 1), Ho, Wo


def fused_dw_pw(taps, col_off, Wo, w_dw, dw_scale, dw_bias, w_pw_bf16,
                pw_scale, pw_bias):
    _, R, Wt, Cin = taps.shape
    Cout = w_pw_bf16.shape[1]
    cap = min(_MAX_ROWS_PER_TILE,
              max(1, _TAP_BYTES_BUDGET // (3 * Wt * Cin * 4)),
              max(1, _TAP_BYTES_BUDGET // (Wo * Cout * 4)))
    TR = _pick_tile(R, cap)

    def kernel(taps_ref, wdw_ref, dsc_ref, dbi_ref, wpw_ref, psc_ref,
               pbi_ref, o_ref):
        w_pw = wpw_ref[...]                        # [Cin, Cout] bf16, resident
        wdw = wdw_ref[...]                         # [9, 1, Cin]  f32
        dsc, dbi = dsc_ref[...], dbi_ref[...]      # [1, Cin]
        psc, pbi = psc_ref[...], pbi_ref[...]      # [1, Cout]
        for r in range(TR):                        # unrolled, TR <= 32
            acc = None
            for kh in range(3):
                for kw in range(3):
                    off = col_off[kw]
                    tap = taps_ref[kh, r, off:off + Wo, :]        # [Wo, Cin]
                    term = tap * wdw[3 * kh + kw]
                    acc = term if acc is None else acc + term
            y = jnp.maximum(acc * dsc + dbi, 0.0)                 # dw BN+ReLU (f32)
            z = jnp.dot(y.astype(jnp.bfloat16), w_pw,
                        preferred_element_type=jnp.float32)       # [Wo, Cout] MXU
            o_ref[r] = jnp.maximum(z * psc + pbi, 0.0)            # pw BN+ReLU

    return pl.pallas_call(
        kernel,
        out_shape=jax.ShapeDtypeStruct((R, Wo, Cout), jnp.float32),
        grid=(R // TR,),
        in_specs=[
            pl.BlockSpec((3, TR, Wt, Cin), lambda i: (0, i, 0, 0)),
            pl.BlockSpec((9, 1, Cin), lambda i: (0, 0, 0)),       # resident
            pl.BlockSpec((1, Cin), lambda i: (0, 0)),
            pl.BlockSpec((1, Cin), lambda i: (0, 0)),
            pl.BlockSpec((Cin, Cout), lambda i: (0, 0)),          # resident
            pl.BlockSpec((1, Cout), lambda i: (0, 0)),
            pl.BlockSpec((1, Cout), lambda i: (0, 0)),
        ],
        out_specs=pl.BlockSpec((TR, Wo, Cout), lambda i: (i, 0, 0)),
        compiler_params=pltpu.CompilerParams(
            dimension_semantics=("parallel",),
            vmem_limit_bytes=_VMEM_LIMIT),
    )(taps, w_dw.reshape(9, 1, Cin), dw_scale.reshape(1, Cin),
      dw_bias.reshape(1, Cin), w_pw_bf16,
      pw_scale.reshape(1, Cout), pw_bias.reshape(1, Cout))


# ---------------------------------------------------------------------------
# Glue: im2col (3x3, pad=1, arbitrary stride) for the first full conv.
# ---------------------------------------------------------------------------
def _im2col(x, stride):
    N, H, W, C = x.shape
    Ho = (H - 1) // stride + 1
    Wo = (W - 1) // stride + 1
    xp = jnp.pad(x, ((0, 0), (1, 1), (1, 1), (0, 0)))
    cols = []
    for kh in range(3):
        for kw in range(3):
            cols.append(xp[:, kh:kh + (Ho - 1) * stride + 1:stride,
                              kw:kw + (Wo - 1) * stride + 1:stride, :])
    patches = jnp.concatenate(cols, axis=-1)            # (kh, kw, c) ordering
    return patches.reshape(N * Ho * Wo, 9 * C), Ho, Wo


# ---------------------------------------------------------------------------
# Parameters (deterministic; eval-mode BN folded to scale/bias).
# Pointwise weights are stored bf16-representable (used identically by kernel
# and reference), so the only precision delta is bf16 activation rounding.
# ---------------------------------------------------------------------------
def init_bn(key, c):
    kg, kb, km, kv = jax.random.split(key, 4)
    gamma = 1.0 + 0.1 * jax.random.normal(kg, (c,), jnp.float32)
    beta = 0.1 * jax.random.normal(kb, (c,), jnp.float32)
    mean = 0.1 * jax.random.normal(km, (c,), jnp.float32)
    var = 1.0 + 0.5 * jax.random.uniform(kv, (c,), jnp.float32)
    scale = gamma / jnp.sqrt(var + 1e-5)
    bias = beta - mean * scale
    return scale, bias


DW_CFG = [(32, 64, 1), (64, 128, 2), (128, 128, 1), (128, 256, 2), (256, 256, 1),
          (256, 512, 1), (512, 512, 1), (512, 512, 1), (512, 512, 1), (512, 512, 1),
          (512, 512, 1), (512, 1024, 1), (1024, 1024, 1)]


def init_params(key):
    params = []
    keys = jax.random.split(key, 1 + len(DW_CFG))
    k1, k2 = jax.random.split(keys[0])
    w_hwio = jax.random.normal(k1, (3, 3, 3, 32), jnp.float32) * math.sqrt(2.0 / (9 * 3))
    scale, bias = init_bn(k2, 32)
    params.append(dict(stride=2, w_hwio=w_hwio, scale=scale, bias=bias))
    for i, (cin, cout, s) in enumerate(DW_CFG):
        k1, k2, k3, k4 = jax.random.split(keys[i + 1], 4)
        w_dw = jax.random.normal(k1, (3, 3, cin), jnp.float32) * math.sqrt(2.0 / 9)
        dscale, dbias = init_bn(k2, cin)
        w_pw = (jax.random.normal(k3, (cin, cout), jnp.float32)
                * math.sqrt(2.0 / cin)).astype(jnp.bfloat16)
        pscale, pbias = init_bn(k4, cout)
        params.append(dict(stride=s, w_dw=w_dw, dw_scale=dscale, dw_bias=dbias,
                           w_pw=w_pw, pw_scale=pscale, pw_bias=pbias))
    return params


# ---------------------------------------------------------------------------
# Forward pass (Pallas kernels on the hot path).
# ---------------------------------------------------------------------------
def net_forward(x_nchw, params):
    N = x_nchw.shape[0]
    x = jnp.transpose(x_nchw, (0, 2, 3, 1)).astype(jnp.float32)   # -> NHWC

    # conv_bn(3, 32, 2): im2col + tiled MXU matmul kernel
    p = params[0]
    cin = x.shape[-1]
    cols, Ho, Wo = _im2col(x, p['stride'])
    y = matmul_bn_relu(cols, p['w_hwio'].reshape(9 * cin, -1), p['scale'], p['bias'])
    x = y.reshape(N, Ho, Wo, -1)

    # 13 fused depthwise+pointwise blocks
    for p in params[1:]:
        taps, col_off, Ho, Wo = _make_dw_taps(x, p['stride'])
        y = fused_dw_pw(taps, col_off, Wo, p['w_dw'], p['dw_scale'], p['dw_bias'],
                        p['w_pw'], p['pw_scale'], p['pw_bias'])
        x = y.reshape(N, Ho, Wo, -1)

    return jnp.transpose(x, (0, 3, 1, 2))  # back to NCHW


# ---------------------------------------------------------------------------
# Pure-JAX reference (f32 convolutions) for correctness check.
# ---------------------------------------------------------------------------
def _ref_conv(x, w_hwio, stride, scale, bias, groups=1, pad=1):
    y = jax.lax.conv_general_dilated(
        x, w_hwio, (stride, stride), [(pad, pad), (pad, pad)],
        dimension_numbers=('NHWC', 'HWIO', 'NHWC'), feature_group_count=groups)
    return jnp.maximum(y * scale + bias, 0.0)


def ref_forward(x_nchw, params):
    x = jnp.transpose(x_nchw, (0, 2, 3, 1)).astype(jnp.float32)
    p = params[0]
    x = _ref_conv(x, p['w_hwio'], p['stride'], p['scale'], p['bias'])
    for p in params[1:]:
        cin = p['w_dw'].shape[-1]
        x = _ref_conv(x, p['w_dw'].reshape(3, 3, 1, cin), p['stride'],
                      p['dw_scale'], p['dw_bias'], groups=cin)
        w_pw = p['w_pw'].astype(jnp.float32)
        x = _ref_conv(x, w_pw.reshape(1, 1, *w_pw.shape), 1,
                      p['pw_scale'], p['pw_bias'], pad=0)
    return jnp.transpose(x, (0, 3, 1, 2))


# TODO(synk): `self.fc = nn.Linear(1024, 1000)` exists in __init__ but is never
# used in forward(), so it is intentionally not implemented.

if __name__ == "__main__":
    key = jax.random.PRNGKey(0)
    kx, kp = jax.random.split(key)
    x = jax.random.normal(kx, (2, 3, 16, 16), jnp.float32)  # NCHW, small spatial
    params = init_params(kp)

    out = net_forward(x, params)
    out = jax.block_until_ready(out)
    assert out.shape == (2, 1024, 2, 2), out.shape

    ref = jax.block_until_ready(ref_forward(x, params))
    rel_err = jnp.max(jnp.abs(out - ref)) / (jnp.max(jnp.abs(ref)) + 1e-6)
    # bf16 MXU operands (f32 accumulation) -> relaxed tolerance vs f32 reference
    assert rel_err < 3e-2, float(rel_err)

    print("KERNEL_OK")
</pallas_src>

<mosaic_0001>
module attributes {stable_mosaic.version = 11 : i64} {
  func.func @_matmul_bn_relu_kernel(%arg0: i32, %arg1: memref<128x27xf32, #tpu.memory_space<vmem>>, %arg2: memref<27x32xf32, #tpu.memory_space<vmem>>, %arg3: memref<1x32xf32, #tpu.memory_space<vmem>>, %arg4: memref<1x32xf32, #tpu.memory_space<vmem>>, %arg5: memref<128x32xf32, #tpu.memory_space<vmem>>) attributes {dimension_semantics = [#tpu.dimension_semantics<parallel>], iteration_bounds = array<i64: 1>, scalar_prefetch = 0 : i64, scratch_operands = 0 : i64, tpu.core_type = #tpu.core_type<tc>, window_params = [{transform_indices = @transform_0, window_bounds = array<i64: 128, 27>}, {pipeline_mode = #tpu.pipeline_mode<synchronous>, transform_indices = @transform_1, window_bounds = array<i64: 27, 32>}, {pipeline_mode = #tpu.pipeline_mode<synchronous>, transform_indices = @transform_2, window_bounds = array<i64: 1, 32>}, {pipeline_mode = #tpu.pipeline_mode<synchronous>, transform_indices = @transform_3, window_bounds = array<i64: 1, 32>}, {transform_indices = @transform_4, window_bounds = array<i64: 128, 32>}]} {
    %c0 = arith.constant 0 : index
    %c0_0 = arith.constant 0 : index
    %0 = vector.load %arg1[%c0, %c0_0] : memref<128x27xf32, #tpu.memory_space<vmem>>, vector<128x27xf32>
    %c0_1 = arith.constant 0 : index
    %c0_2 = arith.constant 0 : index
    %1 = vector.load %arg2[%c0_1, %c0_2] : memref<27x32xf32, #tpu.memory_space<vmem>>, vector<27x32xf32>
    %cst = arith.constant dense<0.000000e+00> : vector<128x32xf32>
    %2 = tpu.matmul %0, %1, %cst {dimension_numbers = #tpu.dot_dimension_numbers<[1], [0], [0], [1], [0, 0, 1, 1], [], []>} : vector<128x27xf32>, vector<27x32xf32>, vector<128x32xf32> -> vector<128x32xf32>
    %c0_3 = arith.constant 0 : index
    %c0_4 = arith.constant 0 : index
    %3 = vector.load %arg3[%c0_3, %c0_4] : memref<1x32xf32, #tpu.memory_space<vmem>>, vector<1x32xf32>
    %4 = vector.broadcast %3 : vector<1x32xf32> to vector<128x32xf32>
    %5 = arith.mulf %2, %4 : vector<128x32xf32>
    %c0_5 = arith.constant 0 : index
    %c0_6 = arith.constant 0 : index
    %6 = vector.load %arg4[%c0_5, %c0_6] : memref<1x32xf32, #tpu.memory_space<vmem>>, vector<1x32xf32>
    %7 = vector.broadcast %6 : vector<1x32xf32> to vector<128x32xf32>
    %8 = arith.addf %5, %7 : vector<128x32xf32>
    %cst_7 = arith.constant 0.000000e+00 : f32
    %9 = vector.broadcast %cst_7 : f32 to vector<128x32xf32>
    %10 = arith.maximumf %8, %9 : vector<128x32xf32>
    %c0_8 = arith.constant 0 : index
    %c0_9 = arith.constant 0 : index
    %11 = vector.load %arg5[%c0_8, %c0_9] : memref<128x32xf32, #tpu.memory_space<vmem>>, vector<128x32xf32>
    tpu.vector_store %arg5[%c0_8, %c0_9], %10 {strides = array<i32>} : memref<128x32xf32, #tpu.memory_space<vmem>>, vector<128x32xf32>,
    return
  }
  func.func @transform_0(%arg0: i32) -> (i32, i32) {
    %c0_i32 = arith.constant 0 : i32
    %c0_i32_0 = arith.constant 0 : i32
    return %arg0, %c0_i32 : i32, i32
  }
  func.func @transform_1(%arg0: i32) -> (i32, i32) {
    %c0_i32 = arith.constant 0 : i32
    %c0_i32_0 = arith.constant 0 : i32
    %c0_i32_1 = arith.constant 0 : i32
    return %c0_i32, %c0_i32_0 : i32, i32
  }
  func.func @transform_2(%arg0: i32) -> (i32, i32) {
    %c0_i32 = arith.constant 0 : i32
    %c0_i32_0 = arith.constant 0 : i32
    %c0_i32_1 = arith.constant 0 : i32
    return %c0_i32, %c0_i32_0 : i32, i32
  }
  func.func @transform_3(%arg0: i32) -> (i32, i32) {
    %c0_i32 = arith.constant 0 : i32
    %c0_i32_0 = arith.constant 0 : i32
    %c0_i32_1 = arith.constant 0 : i32
    return %c0_i32, %c0_i32_0 : i32, i32
  }
  func.func @transform_4(%arg0: i32) -> (i32, i32) {
    %c0_i32 = arith.constant 0 : i32
    %c0_i32_0 = arith.constant 0 : i32
    return %arg0, %c0_i32 : i32, i32
  }
}

</mosaic_0001>

<bundles_post_ra>
// kernel: tpu_custom_call.1
= control target key start
LH: loop header
LB: loop body
LE: loop exit
PB: predicated region body
PF: predicated region fallthrough
CT: control target
= control target key end

     0   :  { %9 = vsyncpa [#allocation3], 0  ;;  %s773_s0 = inlined_call_operand.hbm [shape: f32[128,27], index: 0, kind: input, shape index: {}]   ;;  %s774_s1 = inlined_call_operand.hbm [shape: f32[27,32], index: 1, kind: input, shape index: {}]   ;;  %s775_s2 = inlined_call_operand.hbm [shape: f32[1,32], index: 2, kind: input, shape index: {}]   ;;  %s776_s3 = inlined_call_operand.hbm [shape: f32[1,32], index: 3, kind: input, shape index: {}]   ;;  %s777_s4 = inlined_call_operand.hbm [shape: f32[128,32], index: 4, kind: output, shape index: {}]  }
   0x1   :  { %10 = vsyncpa [#allocation6], 0 }
   0x2   :  { %11 = vsyncpa [#allocation9], 0 }
   0x3   :  { %12 = vsyncpa [#allocation4], 0  ;;  %s596_s15 = smov [#allocation5]   ;;  %s597_s17 = smov [#allocation2]  }
   0x4   :  { %s30_s16 = sshll.u32 %s596_s15, 4  ;;  %s18_s18 = sshll.u32 %s597_s17, 4  ;;  %s31_s16 = int_to_ptr.vmem [resolvable:$true] %s30_s16  ;;  %s629_s18 = int_to_ptr.vmem [resolvable:$true] %s18_s18 }
   0x5   :  { %s478_s21 = scalar_lea.hbm %s774_s1, 512 }
   0x6   :  { %p479_p0 = scmp.ne.s32.totalorder %s774_s1, %s478_s21  ;;  %p482_p1 = scmp.lt.u32.totalorder %s478_s21, %s774_s1 }
   0x8   :  { %p484_p2 = pnand %p482_p1, %p479_p0 }
   0xa   :  { %487 = shalt.err (!%p484_p2)
}
   0xb   :  { %s488_s26 = scalar_lea.vmem %s31_s16, 512  ;;  %p493_p4 = scmp.lt.s32.totalorder %s31_s16, %s31_s16 }
   0xc   :  { %p489_p3 = scmp.ne.s32.totalorder %s31_s16, %s488_s26  ;;  %p494_p5 = scmp.lt.s32.totalorder %s488_s26, %s488_s26 }
   0xe   :  { %p495_p6 = por %p494_p5, %p493_p4 }
  0x10   :  { %p496_p7 = pnand %p495_p6, %p489_p3 }
  0x12   :  { %499 = shalt.err (!%p496_p7)
}
  0x13   :  { %s598_s27 = smov 128   ;;  %s599_s28 = smov 8  }
  0x14   :  { %36 = dma.hbm_to_vmem [thread:$0]  %s774_s1, 512, %s31_s16, [#allocation6], %s598_s27, %s598_s27, %s599_s28  }
  0x15   :  { %s500_s7 = scalar_lea.hbm %s773_s0, 2048 }
  0x16   :  { %p501_p8 = scmp.ne.s32.totalorder %s773_s0, %s500_s7  ;;  %p504_p9 = scmp.lt.u32.totalorder %s500_s7, %s773_s0 }
  0x18   :  { %p506_p10 = pnand %p504_p9, %p501_p8 }
  0x1a   :  { %509 = shalt.err (!%p506_p10)
}
  0x1b   :  { %s510_s12 = scalar_lea.vmem %s629_s18, 2048  ;;  %p515_p12 = scmp.lt.s32.totalorder %s629_s18, %s629_s18 }
  0x1c   :  { %p511_p11 = scmp.ne.s32.totalorder %s629_s18, %s510_s12  ;;  %p516_p13 = scmp.lt.s32.totalorder %s510_s12, %s510_s12 }
  0x1e   :  { %p517_p0 = por %p516_p13, %p515_p12 }
  0x20   :  { %p518_p1 = pnand %p517_p0, %p511_p11 }
  0x22   :  { %521 = shalt.err (!%p518_p1)
}
  0x23   :  { %24 = dma.hbm_to_vmem [thread:$0]  %s773_s0, 2048, %s629_s18, [#allocation3], %s598_s27, %s598_s27, %s599_s28  }
  0x24   :  { %s600_s14 = smov [#allocation7]   ;;  %s601_s16 = smov [#allocation8]  }
  0x25   :  { %s43_s15 = sshll.u32 %s600_s14, 4  ;;  %s53_s17 = sshll.u32 %s601_s16, 4  ;;  %s44_s15 = int_to_ptr.vmem [resolvable:$true] %s43_s15  ;;  %s54_s17 = int_to_ptr.vmem [resolvable:$true] %s53_s17 }
  0x26   :  { %s522_s21 = scalar_lea.hbm %s775_s2, 16 }
  0x27   :  { %p523_p2 = scmp.ne.s32.totalorder %s775_s2, %s522_s21  ;;  %p526_p3 = scmp.lt.u32.totalorder %s522_s21, %s775_s2 }
  0x29   :  { %p528_p4 = pnand %p526_p3, %p523_p2 }
  0x2b   :  { %531 = shalt.err (!%p528_p4)
}
  0x2c   :  { %s532_s0 = scalar_lea.vmem %s44_s15, 16  ;;  %s536_s18 = scalar_lea.vmem %s44_s15, 32 }
  0x2d   :  { %p533_p5 = scmp.ne.s32.totalorder %s44_s15, %s532_s0  ;;  %p537_p6 = scmp.lt.s32.totalorder %s44_s15, %s44_s15 }
  0x2e   :  { %p538_p7 = scmp.lt.s32.totalorder %s536_s18, %s532_s0 }
  0x30   :  { %p539_p8 = por %p538_p7, %p537_p6 }
  0x32   :  { %p540_p9 = pnand %p539_p8, %p533_p5 }
  0x34   :  { %543 = shalt.err (!%p540_p9)
}
  0x35   :  { %46 = dma.hbm_to_vmem [thread:$0]  %s775_s2, 16, %s44_s15, [#allocation6]  }
  0x36   :  { %s544_s6 = scalar_lea.hbm %s776_s3, 16 }
  0x37   :  { %p545_p10 = scmp.ne.s32.totalorder %s776_s3, %s544_s6  ;;  %p548_p11 = scmp.lt.u32.totalorder %s544_s6, %s776_s3 }
  0x39   :  { %p550_p12 = pnand %p548_p11, %p545_p10 }
  0x3b   :  { %553 = shalt.err (!%p550_p12)
}
  0x3c   :  { %s554_s11 = scalar_lea.vmem %s54_s17, 16  ;;  %s558_s12 = scalar_lea.vmem %s54_s17, 32 }
  0x3d   :  { %p555_p13 = scmp.ne.s32.totalorder %s54_s17, %s554_s11  ;;  %p559_p0 = scmp.lt.s32.totalorder %s54_s17, %s54_s17 }
  0x3e   :  { %p560_p1 = scmp.lt.s32.totalorder %s558_s12, %s554_s11 }
  0x40   :  { %p561_p2 = por %p560_p1, %p559_p0 }
  0x42   :  { %p562_p3 = pnand %p561_p2, %p555_p13 }
  0x44   :  { %565 = shalt.err (!%p562_p3)
}
  0x45   :  { %56 = dma.hbm_to_vmem [thread:$0]  %s776_s3, 16, %s54_s17, [#allocation9]  }
  0x46   :  { %588 = dma.done.wait [#allocation3], 2048  }
  0x47   :  { %589 = vsyncadd [#allocation3], 4294965248 }
  0x48   :  { %590 = dma.done.wait [#allocation6], 528  }
  0x49   :  { %591 = vsyncadd [#allocation6], 4294966768 }
  0x4a   :  { %592 = dma.done.wait [#allocation9], 16  }
  0x4b   :  { %593 = vsyncadd [#allocation9], 4294967280  ;;  %vm138_vm0 = vcmask 1042432   ;;  %vm89_vm1 = vcmask 220160   ;;  %v85_v0 = vld [vmem:[#allocation5] sm:$0xff]  ;;  %v86_v1 = vld [vmem:[#allocation5 + $0x8] sm:$0xff] }
  0x4c   :  { %v87_v2 = vld [vmem:[#allocation5 + $0x10] sm:$0xff]  ;;  %v456_v3 = vpack.c.bf16 %v86_v1, %v85_v0  ;;  %v88_v4 = vld [vmem:[#allocation5 + $0x18] sm:$0x7]  ;;  %v69_v5 = vld [vmem:[#allocation2] sm:$0xff]  ;;  %vm602_vm2 = vmmov 1   ;;  %vm349_vm4 = vcmask 261120  }
  0x4d   :  { %v77_v6 = vld [vmem:[#allocation2 + $0x40] sm:$0xff]  ;;  %v460_v7 = vpack.c.bf16 %v88_v4, %v87_v2  ;;  %vm461_vm3 = vmpackc.low %vm138_vm0, %vm602_vm2  ;;  %432 = vmatprep.mubr.msk.f32.mxu0 %vm89_vm1, %v69_v5  ;;  %v70_v8 = vld [vmem:[#allocation2 + $0x8] sm:$0xff]  ;;  %s603_s3 = smov [#allocation10]  }
  0x4e   :  { %444 = vmatprep.mubr.msk.f32.mxu1 %vm89_vm1, %v77_v6  ;;  %457 = vmatprep.subr.bf16.mxu0 %v456_v3  ;;  %v78_v9 = vld [vmem:[#allocation2 + $0x48] sm:$0xff]  ;;  %v71_v10 = vld [vmem:[#allocation2 + $0x10] sm:$0xff]  ;;  %v72_v12 = vld [vmem:[#allocation2 + $0x18] sm:$0xff]  ;;  %s371_s13 = sshll.u32 %s603_s3, 4  ;;  %s372_s13 = int_to_ptr.vmem [resolvable:$true] %s371_s13 }
  0x4f   :  { %466 = vmatprep.subr.bf16.mxu1 %v456_v3  ;;  %459 = vmatpush3.bf16.msra.mxu0 %v456_v3  ;;  %v79_v11 = vld [vmem:[#allocation2 + $0x50] sm:$0xff]  ;;  %v80_v13 = vld [vmem:[#allocation2 + $0x58] sm:$0xff]  ;;  %v73_v14 = vld [vmem:[#allocation2 + $0x20] sm:$0xff]  ;;  %s566_s14 = scalar_lea.vmem %s372_s13, 2048  ;;  %p571_p5 = scmp.lt.s32.totalorder %s372_s13, %s372_s13 }
  0x50   :  { %468 = vmatpush3.bf16.msra.mxu1 %v456_v3  ;;  %462 = vmatprep.subr.msk.bf16.mxu0 %vm461_vm3, %v460_v7  ;;  %v81_v15 = vld [vmem:[#allocation2 + $0x60] sm:$0xff]  ;;  %v74_v16 = vld [vmem:[#allocation2 + $0x28] sm:$0xff]  ;;  %v75_v18 = vld [vmem:[#allocation2 + $0x30] sm:$0xff]  ;;  %p567_p4 = scmp.ne.s32.totalorder %s372_s13, %s566_s14  ;;  %p572_p6 = scmp.lt.s32.totalorder %s566_s14, %s566_s14 }
  0x51   :  { %467 = vmatprep.subr.msk.bf16.mxu1 %vm461_vm3, %v460_v7  ;;  %v82_v17 = vld [vmem:[#allocation2 + $0x68] sm:$0xff]  ;;  %v83_v19 = vld [vmem:[#allocation2 + $0x70] sm:$0xff]  ;;  %v76_v20 = vld [vmem:[#allocation2 + $0x38] sm:$0xff] }
  0x52   :  { %v84_v21 = vld [vmem:[#allocation2 + $0x78] sm:$0xff]  ;;  %v706_v22 = vld [vmem:[#allocation7] ss:$0 sm:$0xff]  ;;  %v708_v24 = vld [vmem:[#allocation8] ss:$0 sm:$0xff]  ;;  %p573_p7 = por %p572_p6, %p571_p5 }
  0x53   :  { %465 = vmatpush3.bf16.msk.msra.mxu0 %vm461_vm3, %v460_v7 }
  0x54   :  { %469 = vmatpush3.bf16.msk.msra.mxu1 %vm461_vm3, %v460_v7  ;;  %p574_p8 = pnand %p573_p7, %p567_p4 }
  0x56   :  { %433 = vmatmul.mubr.msk.f32.vlgmr.msra.gmra.mrb[0].mxu0 %vm89_vm1, %v70_v8 }
  0x57   :  { %445 = vmatmul.mubr.msk.f32.vlgmr.msra.gmra.mrb[0].mxu1 %vm89_vm1, %v78_v9  ;;  %435 = vmatprep.mubr.msk.f32.mxu0 %vm89_vm1, %v71_v10 }
  0x58   :  { %447 = vmatprep.mubr.msk.f32.mxu1 %vm89_vm1, %v79_v11 }
  0x5a   :  { %436 = vmatmul.mubr.msk.f32.gmra.mrb[2].mxu0 %vm89_vm1, %v72_v12 }
  0x5b   :  { %448 = vmatmul.mubr.msk.f32.gmra.mrb[2].mxu1 %vm89_vm1, %v80_v13  ;;  %438 = vmatprep.mubr.msk.f32.mxu0 %vm89_vm1, %v73_v14 }
  0x5c   :  { %450 = vmatprep.mubr.msk.f32.mxu1 %vm89_vm1, %v81_v15 }
  0x5e   :  { %439 = vmatmul.mubr.msk.f32.gmra.mrb[4].mxu0 %vm89_vm1, %v74_v16 }
  0x5f   :  { %451 = vmatmul.mubr.msk.f32.gmra.mrb[4].mxu1 %vm89_vm1, %v82_v17  ;;  %441 = vmatprep.mubr.msk.f32.mxu0 %vm89_vm1, %v75_v18 }
  0x60   :  { %453 = vmatprep.mubr.msk.f32.mxu1 %vm89_vm1, %v83_v19 }
  0x62   :  { %442 = vmatmul.mubr.msk.f32.gmra.mrb[6].mxu0 %vm89_vm1, %v76_v20 }
  0x63   :  { %454 = vmatmul.mubr.msk.f32.gmra.mrb[6].mxu1 %vm89_vm1, %v84_v21 }
 0x129   :  { %v434_v23 = vpop.f32.mrb[0].mxu0 }
 0x12a   :  { %v446_v25 = vpop.f32.mrb[0].mxu1  ;;  %v295_v26 = vmul.f32 %v434_v23, %v706_v22  ;;  %v208_v28 = vpop.f32.mrb[1].mxu0 }
 0x12b   :  { %v303_v27 = vmul.f32 %v446_v25, %v706_v22  ;;  %v248_v29 = vpop.f32.mrb[1].mxu1  ;;  %v294_v30 = vmul.f32 %v706_v22, %v208_v28 }
 0x12c   :  { %v302_v31 = vmul.f32 %v706_v22, %v248_v29  ;;  %v318_v32 = vadd.f32 %v708_v24, %v295_v26 }
 0x12d   :  { %v326_v33 = vadd.f32 %v708_v24, %v303_v27  ;;  %v317_v34 = vadd.f32 %v708_v24, %v294_v30  ;;  %v437_v36 = vpop.f32.mrb[2].mxu0 }
 0x12e   :  { %v325_v35 = vadd.f32 %v708_v24, %v302_v31  ;;  %v449_v37 = vpop.f32.mrb[2].mxu1  ;;  %v334_v38 = vmax.f32 %v318_v32, 0.0  ;;  %v297_v40 = vmul.f32 %v437_v36, %v706_v22  ;;  %v218_v42 = vpop.f32.mrb[3].mxu0 }
 0x12f   :  { %v342_v39 = vmax.f32 %v326_v33, 0.0  ;;  %v305_v41 = vmul.f32 %v449_v37, %v706_v22  ;;  %v258_v43 = vpop.f32.mrb[3].mxu1  ;;  %v333_v44 = vmax.f32 %v317_v34, 0.0  ;;  %v296_v46 = vmul.f32 %v706_v22, %v218_v42 }
 0x130   :  { %v341_v45 = vmax.f32 %v325_v35, 0.0  ;;  %v304_v47 = vmul.f32 %v706_v22, %v258_v43  ;;  %351 = vst.msk [vmem:[#allocation10 + $0x8] sm:$0xff] %vm349_vm4, %v334_v38  ;;  %v320_v48 = vadd.f32 %v708_v24, %v297_v40 }
 0x131   :  { %359 = vst.msk [vmem:[#allocation10 + $0x48] sm:$0xff] %vm349_vm4, %v342_v39  ;;  %v328_v49 = vadd.f32 %v708_v24, %v305_v41  ;;  %350 = vst.msk [vmem:[#allocation10] sm:$0xff] %vm349_vm4, %v333_v44  ;;  %v319_v50 = vadd.f32 %v708_v24, %v296_v46  ;;  %v440_v52 = vpop.f32.mrb[4].mxu0 }
 0x132   :  { %358 = vst.msk [vmem:[#allocation10 + $0x40] sm:$0xff] %vm349_vm4, %v341_v45  ;;  %v327_v51 = vadd.f32 %v708_v24, %v304_v47  ;;  %v452_v53 = vpop.f32.mrb[4].mxu1  ;;  %v336_v54 = vmax.f32 %v320_v48, 0.0  ;;  %v299_v56 = vmul.f32 %v440_v52, %v706_v22  ;;  %v228_v58 = vpop.f32.mrb[5].mxu0 }
 0x133   :  { %v344_v55 = vmax.f32 %v328_v49, 0.0  ;;  %v307_v57 = vmul.f32 %v452_v53, %v706_v22  ;;  %v268_v59 = vpop.f32.mrb[5].mxu1  ;;  %v335_v60 = vmax.f32 %v319_v50, 0.0  ;;  %v298_v62 = vmul.f32 %v706_v22, %v228_v58 }
 0x134   :  { %v343_v61 = vmax.f32 %v327_v51, 0.0  ;;  %v306_v63 = vmul.f32 %v706_v22, %v268_v59  ;;  %353 = vst.msk [vmem:[#allocation10 + $0x18] sm:$0xff] %vm349_vm4, %v336_v54  ;;  %v322_v0 = vadd.f32 %v708_v24, %v299_v56 }
 0x135   :  { %361 = vst.msk [vmem:[#allocation10 + $0x58] sm:$0xff] %vm349_vm4, %v344_v55  ;;  %v330_v1 = vadd.f32 %v708_v24, %v307_v57  ;;  %352 = vst.msk [vmem:[#allocation10 + $0x10] sm:$0xff] %vm349_vm4, %v335_v60  ;;  %v321_v2 = vadd.f32 %v708_v24, %v298_v62  ;;  %v443_v4 = vpop.f32.mrb[6].mxu0 }
 0x136   :  { %360 = vst.msk [vmem:[#allocation10 + $0x50] sm:$0xff] %vm349_vm4, %v343_v61  ;;  %v329_v3 = vadd.f32 %v708_v24, %v306_v63  ;;  %v455_v5 = vpop.f32.mrb[6].mxu1  ;;  %v338_v6 = vmax.f32 %v322_v0, 0.0  ;;  %v301_v8 = vmul.f32 %v443_v4, %v706_v22  ;;  %v238_v10 = vpop.f32.mrb[7].mxu0 }
 0x137   :  { %v346_v7 = vmax.f32 %v330_v1, 0.0  ;;  %v309_v9 = vmul.f32 %v455_v5, %v706_v22  ;;  %v278_v11 = vpop.f32.mrb[7].mxu1  ;;  %v337_v12 = vmax.f32 %v321_v2, 0.0  ;;  %v300_v14 = vmul.f32 %v706_v22, %v238_v10 }
 0x138   :  { %v345_v13 = vmax.f32 %v329_v3, 0.0  ;;  %v308_v15 = vmul.f32 %v706_v22, %v278_v11  ;;  %355 = vst.msk [vmem:[#allocation10 + $0x28] sm:$0xff] %vm349_vm4, %v338_v6  ;;  %v324_v16 = vadd.f32 %v708_v24, %v301_v8 }
 0x139   :  { %363 = vst.msk [vmem:[#allocation10 + $0x68] sm:$0xff] %vm349_vm4, %v346_v7  ;;  %v332_v17 = vadd.f32 %v708_v24, %v309_v9  ;;  %354 = vst.msk [vmem:[#allocation10 + $0x20] sm:$0xff] %vm349_vm4, %v337_v12  ;;  %v323_v18 = vadd.f32 %v708_v24, %v300_v14 }
 0x13a   :  { %362 = vst.msk [vmem:[#allocation10 + $0x60] sm:$0xff] %vm349_vm4, %v345_v13  ;;  %v331_v19 = vadd.f32 %v708_v24, %v308_v15  ;;  %v340_v20 = vmax.f32 %v324_v16, 0.0 }
 0x13b   :  { %v348_v21 = vmax.f32 %v332_v17, 0.0  ;;  %v339_v22 = vmax.f32 %v323_v18, 0.0 }
 0x13c   :  { %v347_v23 = vmax.f32 %v331_v19, 0.0  ;;  %357 = vst.msk [vmem:[#allocation10 + $0x38] sm:$0xff] %vm349_vm4, %v340_v20 }
 0x13d   :  { %365 = vst.msk [vmem:[#allocation10 + $0x78] sm:$0xff] %vm349_vm4, %v348_v21  ;;  %356 = vst.msk [vmem:[#allocation10 + $0x30] sm:$0xff] %vm349_vm4, %v339_v22 }
 0x13e   :  { %364 = vst.msk [vmem:[#allocation10 + $0x70] sm:$0xff] %vm349_vm4, %v347_v23 }
 0x13f   :  { %577 = shalt.err (!%p574_p8)
}
 0x140   :  { %s578_s17 = scalar_lea.hbm %s777_s4, 2048 }
 0x141   :  { %p579_p9 = scmp.ne.s32.totalorder %s777_s4, %s578_s17  ;;  %p582_p10 = scmp.lt.u32.totalorder %s578_s17, %s777_s4 }
 0x143   :  { %p584_p11 = pnand %p582_p10, %p579_p9 }
 0x145   :  { %587 = shalt.err (!%p584_p11)
}
 0x146   :  { %377 = dma.vmem_to_hbm [thread:$0]  %s372_s13, 2048, %s777_s4, [#allocation4], %s598_s27, %s598_s27, %s599_s28  }
 0x147   :  { %594 = dma.done.wait [#allocation4], 2048  }
 0x148   :  { %595 = vsyncadd [#allocation4], 4294965248 }
 0x149   :  { %381 = vsyncpa [#allocation3], 1 }
 0x14a   :  { %382 = vsyncpa [#allocation6], 1 }
 0x14b   :  { %383 = vsyncpa [#allocation9], 1 }
 0x14c   :  { %384 = vsyncpa [#allocation4], 1 }

</bundles_post_ra>
